<compile_context>
chip_gen: v7x
topology: tpu7x:2x2x1
jax: 0.10.0
libtpu: 0.0.40
codegen_flags: <defaults>
</compile_context>

<pallas_src>
import jax
import jax.numpy as jnp
from jax import lax
from jax.experimental import pallas as pl
from jax.experimental.pallas import tpu as pltpu

# ----------------------------- problem sizes --------------------------------
BATCH = 2
META_V_DIM = 8
STATE_DIM = 16
ACTION_DIM = 4
HIDDEN_DIM = 32        # critic hidden AND dynamic-policy hidden (module's hidden_dim)
HYPER_HIDDEN = 32      # hidden width of the weight-generating heads
OUT_LANES = 128        # lane-dense packed output width for evaluate()

# packed head layout: [ z1 (32) | b1 (32) | z2 (32) | b2 (4) ]  -> 100 lanes
_HEAD_Z1_END = HYPER_HIDDEN
_HEAD_B1_END = _HEAD_Z1_END + HIDDEN_DIM
_HEAD_Z2_END = _HEAD_B1_END + HYPER_HIDDEN
_HEAD_B2_END = _HEAD_Z2_END + ACTION_DIM


# ------------------------------ in-kernel helpers ----------------------------
def _actor_logits(meta, state,
                  head_w, head_b, hw1_w2, hw1_b2, hw2_w2, hw2_b2,
                  e1, r1, e2, r2):
    """Hypernetwork weight generation + per-sample dynamic MLP -> logits [B, A]."""
    # --- single packed hypernetwork head matmul (MXU) ---
    head = jnp.dot(meta, head_w, preferred_element_type=jnp.float32) + head_b    # [B, 100]
    z1 = jnp.maximum(head[:, 0:_HEAD_Z1_END], 0.0)                               # [B, 32]
    b1 = head[:, _HEAD_Z1_END:_HEAD_B1_END]                                      # [B, 32]
    z2 = jnp.maximum(head[:, _HEAD_B1_END:_HEAD_Z2_END], 0.0)                    # [B, 32]
    b2 = head[:, _HEAD_Z2_END:_HEAD_B2_END]                                      # [B, 4]

    # --- generated per-sample weights (flat, row-major [s, d] / [d, a]) ---
    w1_flat = jnp.dot(z1, hw1_w2, preferred_element_type=jnp.float32) + hw1_b2   # [B, S*Dh]
    w2_flat = jnp.dot(z2, hw2_w2, preferred_element_type=jnp.float32) + hw2_b2   # [B, Dh*A]

    # --- dynamic MLP with per-sample weights, as matmuls (no reshapes/loops) ---
    # e1 replicates state[s] into lanes s*Dh..s*Dh+Dh-1 ; r1 sums lanes mod Dh.
    s_exp = jnp.dot(state, e1, preferred_element_type=jnp.float32)               # [B, S*Dh]
    h = jnp.dot(s_exp * w1_flat, r1, preferred_element_type=jnp.float32) + b1    # [B, Dh]
    h = jnp.maximum(h, 0.0)
    h_exp = jnp.dot(h, e2, preferred_element_type=jnp.float32)                   # [B, Dh*A]
    logits = jnp.dot(h_exp * w2_flat, r2, preferred_element_type=jnp.float32) + b2  # [B, A]
    return logits


def _log_softmax(logits):
    m = jnp.max(logits, axis=-1, keepdims=True)
    lse = m + jnp.log(jnp.sum(jnp.exp(logits - m), axis=-1, keepdims=True))
    return logits - lse


# ------------------------------ Pallas kernels -------------------------------
def _evaluate_kernel(meta_ref, state_ref, onehot_ref,
                     head_w_ref, head_b_ref,
                     hw1_w2_ref, hw1_b2_ref, hw2_w2_ref, hw2_b2_ref,
                     e1_ref, r1_ref, e2_ref, r2_ref,
                     cw1_ref, cb1_ref, cw2_ref, cb2_ref, cw3_ref, cb3_ref,
                     out_ref):
    """Fused actor + Categorical(logits).{log_prob, entropy} + critic."""
    state = state_ref[...]
    logits = _actor_logits(meta_ref[...], state,
                           head_w_ref[...], head_b_ref[...],
                           hw1_w2_ref[...], hw1_b2_ref[...],
                           hw2_w2_ref[...], hw2_b2_ref[...],
                           e1_ref[...], r1_ref[...], e2_ref[...], r2_ref[...])

    # categorical stats (stable log-softmax)
    logp_all = _log_softmax(logits)                                               # [B, A]
    logp = jnp.sum(onehot_ref[...] * logp_all, axis=-1, keepdims=True)            # [B, 1]
    ent = -jnp.sum(jnp.exp(logp_all) * logp_all, axis=-1, keepdims=True)          # [B, 1]

    # critic: Linear -> ReLU -> Linear -> ReLU -> Linear(->1)
    h1 = jnp.maximum(
        jnp.dot(state, cw1_ref[...], preferred_element_type=jnp.float32) + cb1_ref[...], 0.0)
    h2 = jnp.maximum(
        jnp.dot(h1, cw2_ref[...], preferred_element_type=jnp.float32) + cb2_ref[...], 0.0)
    value = jnp.dot(h2, cw3_ref[...], preferred_element_type=jnp.float32) + cb3_ref[...]  # [B, 1]

    # single lane-dense output slab: [logp | entropy | value | zeros...]
    lane = lax.broadcasted_iota(jnp.int32, out_ref.shape, 1)
    out_ref[...] = jnp.where(lane == 0, logp,
                   jnp.where(lane == 1, ent,
                   jnp.where(lane == 2, value, 0.0)))


def _act_kernel(meta_ref, state_ref,
                head_w_ref, head_b_ref,
                hw1_w2_ref, hw1_b2_ref, hw2_w2_ref, hw2_b2_ref,
                e1_ref, r1_ref, e2_ref, r2_ref,
                logp_ref):
    """Fused actor + log-softmax (sampling done outside on the log-probs)."""
    logits = _actor_logits(meta_ref[...], state_ref[...],
                           head_w_ref[...], head_b_ref[...],
                           hw1_w2_ref[...], hw1_b2_ref[...],
                           hw2_w2_ref[...], hw2_b2_ref[...],
                           e1_ref[...], r1_ref[...], e2_ref[...], r2_ref[...])
    logp_ref[...] = _log_softmax(logits)


# ------------------------------ wrappers -------------------------------------
def _vmem_specs(n):
    return [pl.BlockSpec(memory_space=pltpu.MemorySpace.VMEM) for _ in range(n)]


def evaluate(meta_v, state, action, actor_packed, critic_params):
    """HyperA.evaluate -> (action_logprobs [B], state_values [B,1], dist_entropy [B])."""
    b = meta_v.shape[0]
    onehot = jax.nn.one_hot(action, ACTION_DIM, dtype=jnp.float32)
    args = (meta_v, state, onehot) + tuple(actor_packed) + tuple(critic_params)
    packed = pl.pallas_call(
        _evaluate_kernel,
        out_shape=jax.ShapeDtypeStruct((b, OUT_LANES), jnp.float32),
        in_specs=_vmem_specs(len(args)),
        out_specs=pl.BlockSpec(memory_space=pltpu.MemorySpace.VMEM),
    )(*args)
    return packed[:, 0], packed[:, 2:3], packed[:, 1]


def act(meta_v, state, actor_packed, rng):
    """HyperA.act -> (action [B], action_logprob [B])."""
    b = meta_v.shape[0]
    args = (meta_v, state) + tuple(actor_packed)
    logp_all = pl.pallas_call(
        _act_kernel,
        out_shape=jax.ShapeDtypeStruct((b, ACTION_DIM), jnp.float32),
        in_specs=_vmem_specs(len(args)),
        out_specs=pl.BlockSpec(memory_space=pltpu.MemorySpace.VMEM),
    )(*args)
    action = jax.random.categorical(rng, logp_all)           # Categorical(logits).sample()
    action_logprob = jnp.take_along_axis(logp_all, action[:, None], axis=-1)[:, 0]
    return action, action_logprob


# ------------------------------ parameter init / packing ----------------------
def _kaiming_uniform(key, fan_in, shape):
    bound = (6.0 / fan_in) ** 0.5
    return jax.random.uniform(key, shape, jnp.float32, -bound, bound)


def _bias(key, fan_in, shape):
    bound = 1.0 / (fan_in ** 0.5)
    return jax.random.uniform(key, shape, jnp.float32, -bound, bound)


def init_params(key):
    ks = jax.random.split(key, 18)
    actor_raw = (
        _kaiming_uniform(ks[0], META_V_DIM, (META_V_DIM, HYPER_HIDDEN)),               # hw1_w
        _bias(ks[1], META_V_DIM, (1, HYPER_HIDDEN)),                                    # hw1_b
        _kaiming_uniform(ks[2], HYPER_HIDDEN, (HYPER_HIDDEN, STATE_DIM * HIDDEN_DIM)),  # hw1_w2
        _bias(ks[3], HYPER_HIDDEN, (1, STATE_DIM * HIDDEN_DIM)),                        # hw1_b2
        _kaiming_uniform(ks[4], META_V_DIM, (META_V_DIM, HIDDEN_DIM)),                  # hb1_w
        _bias(ks[5], META_V_DIM, (1, HIDDEN_DIM)),                                      # hb1_b
        _kaiming_uniform(ks[6], META_V_DIM, (META_V_DIM, HYPER_HIDDEN)),                # hw2_w
        _bias(ks[7], META_V_DIM, (1, HYPER_HIDDEN)),                                    # hw2_b
        _kaiming_uniform(ks[8], HYPER_HIDDEN, (HYPER_HIDDEN, HIDDEN_DIM * ACTION_DIM)), # hw2_w2
        _bias(ks[9], HYPER_HIDDEN, (1, HIDDEN_DIM * ACTION_DIM)),                       # hw2_b2
        _kaiming_uniform(ks[10], META_V_DIM, (META_V_DIM, ACTION_DIM)),                 # hb2_w
        _bias(ks[11], META_V_DIM, (1, ACTION_DIM)),                                     # hb2_b
    )
    critic = (
        _kaiming_uniform(ks[12], STATE_DIM, (STATE_DIM, HIDDEN_DIM)),
        _bias(ks[13], STATE_DIM, (1, HIDDEN_DIM)),
        _kaiming_uniform(ks[14], HIDDEN_DIM, (HIDDEN_DIM, HIDDEN_DIM)),
        _bias(ks[15], HIDDEN_DIM, (1, HIDDEN_DIM)),
        _kaiming_uniform(ks[16], HIDDEN_DIM, (HIDDEN_DIM, 1)),
        _bias(ks[17], HIDDEN_DIM, (1, 1)),
    )
    return actor_raw, critic


def pack_actor_params(actor_raw):
    """One-time packing: concat the 4 meta-head matmuls + build static expand/reduce mats."""
    (hw1_w, hw1_b, hw1_w2, hw1_b2, hb1_w, hb1_b,
     hw2_w, hw2_b, hw2_w2, hw2_b2, hb2_w, hb2_b) = actor_raw
    head_w = jnp.concatenate([hw1_w, hb1_w, hw2_w, hb2_w], axis=1)     # [Dm, 100]
    head_b = jnp.concatenate([hw1_b, hb1_b, hw2_b, hb2_b], axis=1)     # [1, 100]
    # e1[s, s*Dh + d] = 1 (expand state over lanes); r1[s*Dh + d, d] = 1 (reduce over s)
    e1 = jnp.kron(jnp.eye(STATE_DIM, dtype=jnp.float32),
                  jnp.ones((1, HIDDEN_DIM), jnp.float32))              # [S, S*Dh]
    r1 = jnp.kron(jnp.ones((STATE_DIM, 1), jnp.float32),
                  jnp.eye(HIDDEN_DIM, dtype=jnp.float32))              # [S*Dh, Dh]
    e2 = jnp.kron(jnp.eye(HIDDEN_DIM, dtype=jnp.float32),
                  jnp.ones((1, ACTION_DIM), jnp.float32))              # [Dh, Dh*A]
    r2 = jnp.kron(jnp.ones((HIDDEN_DIM, 1), jnp.float32),
                  jnp.eye(ACTION_DIM, dtype=jnp.float32))              # [Dh*A, A]
    return (head_w, head_b, hw1_w2, hw1_b2, hw2_w2, hw2_b2, e1, r1, e2, r2)


# ------------------------------ plain-JAX references --------------------------
def _actor_ref(meta, state, p):
    (hw1_w, hw1_b, hw1_w2, hw1_b2, hb1_w, hb1_b,
     hw2_w, hw2_b, hw2_w2, hw2_b2, hb2_w, hb2_b) = p
    b = meta.shape[0]
    z1 = jax.nn.relu(meta @ hw1_w + hw1_b)
    w1 = (z1 @ hw1_w2 + hw1_b2).reshape(b, STATE_DIM, HIDDEN_DIM)
    b1 = meta @ hb1_w + hb1_b
    z2 = jax.nn.relu(meta @ hw2_w + hw2_b)
    w2 = (z2 @ hw2_w2 + hw2_b2).reshape(b, HIDDEN_DIM, ACTION_DIM)
    b2 = meta @ hb2_w + hb2_b
    h = jax.nn.relu(jnp.einsum("bs,bsd->bd", state, w1) + b1)
    return jnp.einsum("bd,bda->ba", h, w2) + b2


def _critic_ref(state, p):
    w1, b1, w2, b2, w3, b3 = p
    h = jax.nn.relu(state @ w1 + b1)
    h = jax.nn.relu(h @ w2 + b2)
    return h @ w3 + b3


# ------------------------------------ main ------------------------------------
if __name__ == "__main__":
    key = jax.random.PRNGKey(0)
    k_param, k_meta, k_state, k_act, k_action = jax.random.split(key, 5)

    actor_raw, critic_params = init_params(k_param)
    actor_packed = pack_actor_params(actor_raw)

    meta_v = jax.random.normal(k_meta, (BATCH, META_V_DIM), jnp.float32)
    state = jax.random.normal(k_state, (BATCH, STATE_DIM), jnp.float32)
    action = jax.random.randint(k_action, (BATCH,), 0, ACTION_DIM)

    act_jit = jax.jit(act)
    evaluate_jit = jax.jit(evaluate)

    # act() path
    sampled_action, sampled_logprob = act_jit(meta_v, state, actor_packed, k_act)

    # evaluate() path
    logprobs, values, entropy = evaluate_jit(meta_v, state, action, actor_packed, critic_params)
    jax.block_until_ready((sampled_action, sampled_logprob, logprobs, values, entropy))

    # correctness check vs plain-JAX reference
    ref_logits = _actor_ref(meta_v, state, actor_raw)
    ref_logp_all = jax.nn.log_softmax(ref_logits, axis=-1)
    ref_logprobs = jnp.take_along_axis(ref_logp_all, action[:, None], axis=-1)[:, 0]
    ref_entropy = -jnp.sum(jnp.exp(ref_logp_all) * ref_logp_all, axis=-1)
    ref_values = _critic_ref(state, critic_params)
    ref_sampled_logprob = jnp.take_along_axis(ref_logp_all, sampled_action[:, None], axis=-1)[:, 0]

    assert jnp.allclose(logprobs, ref_logprobs, atol=1e-3), "logprob mismatch"
    assert jnp.allclose(entropy, ref_entropy, atol=1e-3), "entropy mismatch"
    assert jnp.allclose(values, ref_values, atol=1e-3), "critic mismatch"
    assert jnp.allclose(sampled_logprob, ref_sampled_logprob, atol=1e-3), "act logprob mismatch"

    print("KERNEL_OK")
</pallas_src>

<mosaic_0001>
module attributes {stable_mosaic.version = 11 : i64} {
  func.func @_act_kernel(%arg0: memref<2x8xf32, #tpu.memory_space<vmem>>, %arg1: memref<2x16xf32, #tpu.memory_space<vmem>>, %arg2: memref<8x100xf32, #tpu.memory_space<vmem>>, %arg3: memref<1x100xf32, #tpu.memory_space<vmem>>, %arg4: memref<32x512xf32, #tpu.memory_space<vmem>>, %arg5: memref<1x512xf32, #tpu.memory_space<vmem>>, %arg6: memref<32x128xf32, #tpu.memory_space<vmem>>, %arg7: memref<1x128xf32, #tpu.memory_space<vmem>>, %arg8: memref<16x512xf32, #tpu.memory_space<vmem>>, %arg9: memref<512x32xf32, #tpu.memory_space<vmem>>, %arg10: memref<32x128xf32, #tpu.memory_space<vmem>>, %arg11: memref<128x4xf32, #tpu.memory_space<vmem>>, %arg12: memref<2x4xf32, #tpu.memory_space<vmem>>) attributes {dimension_semantics = [], scalar_prefetch = 0 : i64, scratch_operands = 0 : i64, tpu.core_type = #tpu.core_type<tc>} {
    %c0 = arith.constant 0 : index
    %c0_0 = arith.constant 0 : index
    %0 = vector.load %arg0[%c0, %c0_0] : memref<2x8xf32, #tpu.memory_space<vmem>>, vector<2x8xf32>
    %c0_1 = arith.constant 0 : index
    %c0_2 = arith.constant 0 : index
    %1 = vector.load %arg1[%c0_1, %c0_2] : memref<2x16xf32, #tpu.memory_space<vmem>>, vector<2x16xf32>
    %c0_3 = arith.constant 0 : index
    %c0_4 = arith.constant 0 : index
    %2 = vector.load %arg2[%c0_3, %c0_4] : memref<8x100xf32, #tpu.memory_space<vmem>>, vector<8x100xf32>
    %c0_5 = arith.constant 0 : index
    %c0_6 = arith.constant 0 : index
    %3 = vector.load %arg3[%c0_5, %c0_6] : memref<1x100xf32, #tpu.memory_space<vmem>>, vector<1x100xf32>
    %c0_7 = arith.constant 0 : index
    %c0_8 = arith.constant 0 : index
    %4 = vector.load %arg4[%c0_7, %c0_8] : memref<32x512xf32, #tpu.memory_space<vmem>>, vector<32x512xf32>
    %c0_9 = arith.constant 0 : index
    %c0_10 = arith.constant 0 : index
    %5 = vector.load %arg5[%c0_9, %c0_10] : memref<1x512xf32, #tpu.memory_space<vmem>>, vector<1x512xf32>
    %c0_11 = arith.constant 0 : index
    %c0_12 = arith.constant 0 : index
    %6 = vector.load %arg6[%c0_11, %c0_12] : memref<32x128xf32, #tpu.memory_space<vmem>>, vector<32x128xf32>
    %c0_13 = arith.constant 0 : index
    %c0_14 = arith.constant 0 : index
    %7 = vector.load %arg7[%c0_13, %c0_14] : memref<1x128xf32, #tpu.memory_space<vmem>>, vector<1x128xf32>
    %c0_15 = arith.constant 0 : index
    %c0_16 = arith.constant 0 : index
    %8 = vector.load %arg8[%c0_15, %c0_16] : memref<16x512xf32, #tpu.memory_space<vmem>>, vector<16x512xf32>
    %c0_17 = arith.constant 0 : index
    %c0_18 = arith.constant 0 : index
    %9 = vector.load %arg9[%c0_17, %c0_18] : memref<512x32xf32, #tpu.memory_space<vmem>>, vector<512x32xf32>
    %c0_19 = arith.constant 0 : index
    %c0_20 = arith.constant 0 : index
    %10 = vector.load %arg10[%c0_19, %c0_20] : memref<32x128xf32, #tpu.memory_space<vmem>>, vector<32x128xf32>
    %c0_21 = arith.constant 0 : index
    %c0_22 = arith.constant 0 : index
    %11 = vector.load %arg11[%c0_21, %c0_22] : memref<128x4xf32, #tpu.memory_space<vmem>>, vector<128x4xf32>
    %cst = arith.constant dense<0.000000e+00> : vector<2x100xf32>
    %12 = tpu.matmul %0, %2, %cst {dimension_numbers = #tpu.dot_dimension_numbers<[1], [0], [0], [1], [0, 0, 1, 1], [], []>} : vector<2x8xf32>, vector<8x100xf32>, vector<2x100xf32> -> vector<2x100xf32>
    %13 = vector.broadcast %3 : vector<1x100xf32> to vector<2x100xf32>
    %14 = arith.addf %12, %13 : vector<2x100xf32>
    %15 = vector.extract_strided_slice %14 {offsets = [0, 0], sizes = [2, 32], strides = [1, 1]} : vector<2x100xf32> to vector<2x32xf32>
    %cst_23 = arith.constant 0.000000e+00 : f32
    %16 = vector.broadcast %cst_23 : f32 to vector<2x32xf32>
    %17 = arith.maximumf %15, %16 : vector<2x32xf32>
    %18 = vector.extract_strided_slice %14 {offsets = [0, 32], sizes = [2, 32], strides = [1, 1]} : vector<2x100xf32> to vector<2x32xf32>
    %19 = vector.extract_strided_slice %14 {offsets = [0, 64], sizes = [2, 32], strides = [1, 1]} : vector<2x100xf32> to vector<2x32xf32>
    %cst_24 = arith.constant 0.000000e+00 : f32
    %20 = vector.broadcast %cst_24 : f32 to vector<2x32xf32>
    %21 = arith.maximumf %19, %20 : vector<2x32xf32>
    %22 = vector.extract_strided_slice %14 {offsets = [0, 96], sizes = [2, 4], strides = [1, 1]} : vector<2x100xf32> to vector<2x4xf32>
    %cst_25 = arith.constant dense<0.000000e+00> : vector<2x512xf32>
    %23 = tpu.matmul %17, %4, %cst_25 {dimension_numbers = #tpu.dot_dimension_numbers<[1], [0], [0], [1], [0, 0, 1, 1], [], []>} : vector<2x32xf32>, vector<32x512xf32>, vector<2x512xf32> -> vector<2x512xf32>
    %24 = vector.broadcast %5 : vector<1x512xf32> to vector<2x512xf32>
    %25 = arith.addf %23, %24 : vector<2x512xf32>
    %cst_26 = arith.constant dense<0.000000e+00> : vector<2x128xf32>
    %26 = tpu.matmul %21, %6, %cst_26 {dimension_numbers = #tpu.dot_dimension_numbers<[1], [0], [0], [1], [0, 0, 1, 1], [], []>} : vector<2x32xf32>, vector<32x128xf32>, vector<2x128xf32> -> vector<2x128xf32>
    %27 = vector.broadcast %7 : vector<1x128xf32> to vector<2x128xf32>
    %28 = arith.addf %26, %27 : vector<2x128xf32>
    %cst_27 = arith.constant dense<0.000000e+00> : vector<2x512xf32>
    %29 = tpu.matmul %1, %8, %cst_27 {dimension_numbers = #tpu.dot_dimension_numbers<[1], [0], [0], [1], [0, 0, 1, 1], [], []>} : vector<2x16xf32>, vector<16x512xf32>, vector<2x512xf32> -> vector<2x512xf32>
    %30 = arith.mulf %29, %25 : vector<2x512xf32>
    %cst_28 = arith.constant dense<0.000000e+00> : vector<2x32xf32>
    %31 = tpu.matmul %30, %9, %cst_28 {dimension_numbers = #tpu.dot_dimension_numbers<[1], [0], [0], [1], [0, 0, 1, 1], [], []>} : vector<2x512xf32>, vector<512x32xf32>, vector<2x32xf32> -> vector<2x32xf32>
    %32 = arith.addf %31, %18 : vector<2x32xf32>
    %cst_29 = arith.constant 0.000000e+00 : f32
    %33 = vector.broadcast %cst_29 : f32 to vector<2x32xf32>
    %34 = arith.maximumf %32, %33 : vector<2x32xf32>
    %cst_30 = arith.constant dense<0.000000e+00> : vector<2x128xf32>
    %35 = tpu.matmul %34, %10, %cst_30 {dimension_numbers = #tpu.dot_dimension_numbers<[1], [0], [0], [1], [0, 0, 1, 1], [], []>} : vector<2x32xf32>, vector<32x128xf32>, vector<2x128xf32> -> vector<2x128xf32>
    %36 = arith.mulf %35, %28 : vector<2x128xf32>
    %cst_31 = arith.constant dense<0.000000e+00> : vector<2x4xf32>
    %37 = tpu.matmul %36, %11, %cst_31 {dimension_numbers = #tpu.dot_dimension_numbers<[1], [0], [0], [1], [0, 0, 1, 1], [], []>} : vector<2x128xf32>, vector<128x4xf32>, vector<2x4xf32> -> vector<2x4xf32>
    %38 = arith.addf %37, %22 : vector<2x4xf32>
    %cst_32 = arith.constant dense<0xFF800000> : vector<2xf32>
    %39 = vector.multi_reduction <maximumf>, %38, %cst_32 [1] : vector<2x4xf32> to vector<2xf32>
    %40 = vector.shape_cast %39 : vector<2xf32> to vector<2x1xf32>
    %41 = vector.broadcast %40 : vector<2x1xf32> to vector<2x4xf32>
    %42 = arith.subf %38, %41 : vector<2x4xf32>
    %43 = math.exp %42 : vector<2x4xf32>
    %cst_33 = arith.constant dense<0.000000e+00> : vector<2xf32>
    %44 = vector.multi_reduction <add>, %43, %cst_33 [1] : vector<2x4xf32> to vector<2xf32>
    %45 = vector.shape_cast %44 : vector<2xf32> to vector<2x1xf32>
    %46 = math.log %45 : vector<2x1xf32>
    %47 = arith.addf %40, %46 : vector<2x1xf32>
    %48 = vector.broadcast %47 : vector<2x1xf32> to vector<2x4xf32>
    %49 = arith.subf %38, %48 : vector<2x4xf32>
    %c0_34 = arith.constant 0 : index
    %c0_35 = arith.constant 0 : index
    %50 = vector.load %arg12[%c0_34, %c0_35] : memref<2x4xf32, #tpu.memory_space<vmem>>, vector<2x4xf32>
    tpu.vector_store %arg12[%c0_34, %c0_35], %49 {strides = array<i32>} : memref<2x4xf32, #tpu.memory_space<vmem>>, vector<2x4xf32>,
    return
  }
}

</mosaic_0001>

<bundles_post_ra>
// kernel: act.1
= control target key start
LH: loop header
LB: loop body
LE: loop exit
PB: predicated region body
PF: predicated region fallthrough
CT: control target
= control target key end

     0   :  { %vm165_vm0 = vcmask 64512   ;;  %v1252_v0 = vmov 0.0   ;;  %vm1253_vm1 = vmmov 0   ;;  %vm487_vm2 = vcmask 130048   ;;  %s1255_s30 = smov 64   ;;  %s1256_s22 = smov 96   ;;  %s1727_s2 = inlined_call_operand.vmem [shape: f32[8,100], index: 2, kind: input, shape index: {}]   ;;  %s1728_s0 = inlined_call_operand.vmem [shape: f32[2,8], index: 0, kind: input, shape index: {}]   ;;  %s1729_s4 = inlined_call_operand.vmem [shape: f32[32,512], index: 4, kind: input, shape index: {}]   ;;  %s1730_s8 = inlined_call_operand.vmem [shape: f32[16,512], index: 8, kind: input, shape index: {}]   ;;  %s1731_s1 = inlined_call_operand.vmem [shape: f32[2,16], index: 1, kind: input, shape index: {}]   ;;  %s1732_s3 = inlined_call_operand.vmem [shape: f32[1,100], index: 3, kind: input, shape index: {}]   ;;  %s1733_s9 = inlined_call_operand.vmem [shape: f32[512,32], index: 9, kind: input, shape index: {}]   ;;  %s1734_s6 = inlined_call_operand.vmem [shape: f32[32,128], index: 6, kind: input, shape index: {}]   ;;  %s1735_s5 = inlined_call_operand.vmem [shape: f32[1,512], index: 5, kind: input, shape index: {}]   ;;  %s1736_s10 = inlined_call_operand.vmem [shape: f32[32,128], index: 10, kind: input, shape index: {}]   ;;  %s1737_s11 = inlined_call_operand.vmem [shape: f32[128,4], index: 11, kind: input, shape index: {}]   ;;  %s1738_s7 = inlined_call_operand.vmem [shape: f32[1,128], index: 7, kind: input, shape index: {}]   ;;  %s1739_s12 = inlined_call_operand.vmem [shape: f32[2,4], index: 12, kind: output, shape index: {}]  }
   0x1   :  { %1056 = vmatprep.subr.mxu0 %v1252_v0  ;;  %v43_v1 = vld [vmem:[%s1727_s2] sm:$0xff]  ;;  %1058 = vmatprep.mubr.msk.f32.mxu0 %vm1253_vm1, %v1252_v0  ;;  %v46_v3 = vld [vmem:[%s1729_s4 + $0x8] sm:$0xff]  ;;  %v48_v15 = vld [vmem:[%s1729_s4 + $0x18] sm:$0xff]  ;;  %vm261_vm3 = vcmask 261120   ;;  %vm929_vm4 = vcmask 25600  }
   0x2   :  { %v41_v2 = vld [vmem:[%s1728_s0] sm:$0x3]  ;;  %1057 = vmatpush3.msra.mxu0 %v43_v1  ;;  %v50_v4 = vld [vmem:[%s1729_s4 + $0x28] sm:$0xff]  ;;  %329 = vmatprep.mubr.f32.mxu1 %v1252_v0  ;;  %v52_v16 = vld [vmem:[%s1729_s4 + $0x38] sm:$0xff] }
   0x3   :  { %v45_v5 = vld [vmem:[%s1729_s4] sm:$0xff]  ;;  %1059 = vmatmul.mubr.msk.f32.vlgmr.msra.gmra.mrb[0].mxu0 %vm165_vm0, %v41_v2  ;;  %v1118_v7 = vpack.c.bf16 %v50_v4, %v46_v3  ;;  %v54_v9 = vld [vmem:[%s1729_s4 + $0x48] sm:$0xff]  ;;  %v1126_v17 = vpack.c.bf16 %v52_v16, %v48_v15  ;;  %v70_v18 = vld [vmem:[%s1730_s8 + $0x18] sm:$0xff]  ;;  %v1257_v4 = vmov 0.0|0.0  }
   0x4   :  { %v49_v6 = vld [vmem:[%s1729_s4 + $0x20] sm:$0xff]  ;;  %626 = vmatprep.mubr.f32.mxu0 %v1252_v0  ;;  %v58_v10 = vld [vmem:[%s1729_s4 + $0x68] sm:$0xff]  ;;  %v74_v19 = vld [vmem:[%s1730_s8 + $0x38] sm:$0xff] }
   0x5   :  { %v1120_v8 = vpack.c.bf16 %v49_v6, %v45_v5  ;;  %1119 = vmatprep.subr.bf16.mxu1 %v1118_v7  ;;  %v1122_v11 = vpack.c.bf16 %v58_v10, %v54_v9  ;;  %v53_v12 = vld [vmem:[%s1729_s4 + $0x40] sm:$0xff]  ;;  %v1144_v20 = vpack.c.bf16 %v74_v19, %v70_v18  ;;  %v69_v21 = vld [vmem:[%s1730_s8 + $0x10] sm:$0xff]  ;;  %v124_v27 = vld [vmem:[%s1733_s9 + $0x188] sm:$0xff] }
   0x6   :  { %v57_v13 = vld [vmem:[%s1729_s4 + $0x60] sm:$0xff]  ;;  %v73_v22 = vld [vmem:[%s1730_s8 + $0x30] sm:$0xff]  ;;  %v108_v30 = vld [vmem:[%s1733_s9 + $0x108] sm:$0xff] }
   0x7   :  { %1121 = vmatpush1.bf16.msra.mxu1 %v1120_v8  ;;  %v1124_v14 = vpack.c.bf16 %v57_v13, %v53_v12  ;;  %v1146_v23 = vpack.c.bf16 %v73_v22, %v69_v21  ;;  %1145 = vmatprep.subr.bf16.mxu0 %v1144_v20  ;;  %v1379_v24 = vld [vmem:[%s1731_s1] sm:$0x3]  ;;  %v125_v31 = vld [vmem:[%s1733_s9 + $0x190] sm:$0xff]  ;;  %v126_v32 = vld [vmem:[%s1733_s9 + $0x198] sm:$0xff]  ;;  %s1254_s1 = smov 32  }
   0x8   :  { %1123 = vmatprep.subr.bf16.mxu1 %v1122_v11  ;;  %v948_v25 = vld [vmem:[%s1732_s3] ss:$0 sm:$0xff]  ;;  %v47_v33 = vld [vmem:[%s1729_s4 + $0x10] sm:$0xff]  ;;  %v56_v35 = vld [vmem:[%s1729_s4 + $0x58] sm:$0xff]  ;;  %v1184_v37 = vpack.c.bf16 %v126_v32, %v125_v31 }
   0x9   :  { %1147 = vmatpush1.bf16.msra.mxu0 %v1146_v23  ;;  %v123_v26 = vld [vmem:[%s1733_s9 + $0x180] sm:$0xff]  ;;  %v51_v34 = vld [vmem:[%s1729_s4 + $0x30] sm:$0xff]  ;;  %v60_v39 = vld [vmem:[%s1729_s4 + $0x78] sm:$0xff] }
   0xa   :  { %v107_v28 = vld [vmem:[%s1733_s9 + $0x100] sm:$0xff]  ;;  %v1180_v29 = vpack.c.bf16 %v124_v27, %v123_v26  ;;  %v109_v40 = vld [vmem:[%s1733_s9 + $0x110] sm:$0xff]  ;;  %v110_v41 = vld [vmem:[%s1733_s9 + $0x118] sm:$0xff]  ;;  %v1128_v46 = vpack.c.bf16 %v51_v34, %v47_v33  ;;  %v1130_v48 = vpack.c.bf16 %v60_v39, %v56_v35 }
   0xb   :  { %1125 = vmatpush1.bf16.msra.mxu1 %v1124_v14  ;;  %v1182_v36 = vpack.c.bf16 %v108_v30, %v107_v28  ;;  %v127_v44 = vld [vmem:[%s1733_s9 + $0x1a0] sm:$0xff]  ;;  %v128_v45 = vld [vmem:[%s1733_s9 + $0x1a8] sm:$0xff]  ;;  %v55_v49 = vld [vmem:[%s1729_s4 + $0x50] sm:$0xff]  ;;  %v1186_v51 = vpack.c.bf16 %v110_v41, %v109_v40 }
   0xc   :  { %1127 = vmatprep.subr.bf16.mxu1 %v1126_v17  ;;  %955 = vmatmul.mubr.msk.f32.vlgmr.msra.gmra.mrb[2].mxu0 %vm487_vm2, %v1379_v24  ;;  %v59_v50 = vld [vmem:[%s1729_s4 + $0x70] sm:$0xff]  ;;  %v1188_v52 = vpack.c.bf16 %v128_v45, %v127_v44  ;;  %v111_v53 = vld [vmem:[%s1733_s9 + $0x120] sm:$0xff]  ;;  %v112_v54 = vld [vmem:[%s1733_s9 + $0x128] sm:$0xff] }
   0xd   :  { %1181 = vmatprep.subr.bf16.mxu0 %v1180_v29  ;;  %v129_v55 = vld [vmem:[%s1733_s9 + $0x1b0] sm:$0xff]  ;;  %v130_v56 = vld [vmem:[%s1733_s9 + $0x1b8] sm:$0xff]  ;;  %v1132_v57 = vpack.c.bf16 %v59_v50, %v55_v49  ;;  %v62_v58 = vld [vmem:[%s1734_s6] sm:$0xff]  ;;  %v1190_v60 = vpack.c.bf16 %v112_v54, %v111_v53 }
   0xe   :  { %1183 = vmatpush3.bf16.msra.mxu0 %v1182_v36  ;;  %v63_v59 = vld [vmem:[%s1734_s6 + $0x8] sm:$0xff]  ;;  %v1192_v61 = vpack.c.bf16 %v130_v56, %v129_v55  ;;  %v113_v62 = vld [vmem:[%s1733_s9 + $0x130] sm:$0xff]  ;;  %v114_v63 = vld [vmem:[%s1733_s9 + $0x138] sm:$0xff] }
   0xf   :  { %1185 = vmatprep.subr.bf16.mxu0 %v1184_v37  ;;  %v131_v1 = vld [vmem:[%s1733_s9 + $0x1c0] sm:$0xff]  ;;  %v132_v2 = vld [vmem:[%s1733_s9 + $0x1c8] sm:$0xff]  ;;  %v1135_v3 = vpack.c.bf16 %v63_v59, %v62_v58  ;;  %v64_v5 = vld [vmem:[%s1734_s6 + $0x10] sm:$0xff]  ;;  %v1194_v8 = vpack.c.bf16 %v114_v63, %v113_v62 }
  0x10   :  { %v65_v6 = vld [vmem:[%s1734_s6 + $0x18] sm:$0xff]  ;;  %v68_v7 = vld [vmem:[%s1730_s8 + $0x8] sm:$0xff]  ;;  %v1196_v10 = vpack.c.bf16 %v132_v2, %v131_v1  ;;  %v115_v11 = vld [vmem:[%s1733_s9 + $0x140] sm:$0xff] }
  0x11   :  { %v72_v9 = vld [vmem:[%s1730_s8 + $0x28] sm:$0xff]  ;;  %v1138_v13 = vpack.c.bf16 %v65_v6, %v64_v5  ;;  %v133_v16 = vld [vmem:[%s1733_s9 + $0x1d0] sm:$0xff]  ;;  %v134_v17 = vld [vmem:[%s1733_s9 + $0x1d8] sm:$0xff] }
  0x12   :  { %1187 = vmatpush3.bf16.msra.mxu0 %v1186_v51  ;;  %v116_v12 = vld [vmem:[%s1733_s9 + $0x148] sm:$0xff]  ;;  %v1140_v14 = vpack.c.bf16 %v72_v9, %v68_v7  ;;  %v1200_v18 = vpack.c.bf16 %v134_v17, %v133_v16  ;;  %v117_v19 = vld [vmem:[%s1733_s9 + $0x150] sm:$0xff]  ;;  %v118_v20 = vld [vmem:[%s1733_s9 + $0x158] sm:$0xff] }
  0x13   :  { %1189 = vmatprep.subr.bf16.mxu0 %v1188_v52  ;;  %v1198_v15 = vpack.c.bf16 %v116_v12, %v115_v11  ;;  %v1202_v21 = vpack.c.bf16 %v118_v20, %v117_v19  ;;  %v135_v22 = vld [vmem:[%s1733_s9 + $0x1e0] sm:$0xff]  ;;  %v136_v23 = vld [vmem:[%s1733_s9 + $0x1e8] sm:$0xff]  ;;  %v137_v29 = vld [vmem:[%s1733_s9 + $0x1f0] sm:$0xff] }
  0x14   :  { %v119_v26 = vld [vmem:[%s1733_s9 + $0x160] sm:$0xff]  ;;  %v120_v27 = vld [vmem:[%s1733_s9 + $0x168] sm:$0xff]  ;;  %v138_v30 = vld [vmem:[%s1733_s9 + $0x1f8] sm:$0xff] }
  0x15   :  { %v1206_v28 = vpack.c.bf16 %v120_v27, %v119_v26  ;;  %v1208_v31 = vpack.c.bf16 %v138_v30, %v137_v29  ;;  %v121_v32 = vld [vmem:[%s1733_s9 + $0x170] sm:$0xff]  ;;  %v122_v33 = vld [vmem:[%s1733_s9 + $0x178] sm:$0xff]  ;;  %v67_v37 = vld [vmem:[%s1730_s8] sm:$0xff]  ;;  %v241_v27 = vlaneseq }
  0x16   :  { %1191 = vmatpush3.bf16.msra.mxu0 %v1190_v60  ;;  %v1210_v35 = vpack.c.bf16 %v122_v33, %v121_v32  ;;  %v91_v39 = vld [vmem:[%s1733_s9 + $0x80] sm:$0xff]  ;;  %v92_v40 = vld [vmem:[%s1733_s9 + $0x88] sm:$0xff]  ;;  %v77_v50 = vld [vmem:[%s1733_s9 + $0x10] sm:$0xff] }
  0x17   :  { %1193 = vmatprep.subr.bf16.mxu0 %v1192_v61  ;;  %v76_v44 = vld [vmem:[%s1733_s9 + $0x8] sm:$0xff]  ;;  %v78_v51 = vld [vmem:[%s1733_s9 + $0x18] sm:$0xff]  ;;  %v95_v52 = vld [vmem:[%s1733_s9 + $0xa0] sm:$0xff] }
  0x18   :  { %v96_v53 = vld [vmem:[%s1733_s9 + $0xa8] sm:$0xff]  ;;  %v1154_v54 = vpack.c.bf16 %v78_v51, %v77_v50  ;;  %v79_v56 = vld [vmem:[%s1733_s9 + $0x20] sm:$0xff]  ;;  %v97_v58 = vld [vmem:[%s1733_s9 + $0xb0] sm:$0xff] }
  0x19   :  { %v1156_v55 = vpack.c.bf16 %v96_v53, %v95_v52  ;;  %v81_v61 = vld [vmem:[%s1733_s9 + $0x30] sm:$0xff]  ;;  %v82_v62 = vld [vmem:[%s1733_s9 + $0x38] sm:$0xff]  ;;  %v99_v63 = vld [vmem:[%s1733_s9 + $0xc0] sm:$0xff] }
  0x1a   :  { %1195 = vmatpush3.bf16.msra.mxu0 %v1194_v8  ;;  %v100_v1 = vld [vmem:[%s1733_s9 + $0xc8] sm:$0xff]  ;;  %v1162_v2 = vpack.c.bf16 %v82_v62, %v81_v61  ;;  %v83_v5 = vld [vmem:[%s1733_s9 + $0x40] sm:$0xff]  ;;  %v101_v7 = vld [vmem:[%s1733_s9 + $0xd0] sm:$0xff] }
  0x1b   :  { %1197 = vmatprep.subr.bf16.mxu0 %v1196_v10  ;;  %v84_v6 = vld [vmem:[%s1733_s9 + $0x48] sm:$0xff]  ;;  %v102_v8 = vld [vmem:[%s1733_s9 + $0xd8] sm:$0xff]  ;;  %v85_v11 = vld [vmem:[%s1733_s9 + $0x50] sm:$0xff] }
  0x1c   :  { %v1166_v9 = vpack.c.bf16 %v84_v6, %v83_v5  ;;  %v1168_v10 = vpack.c.bf16 %v102_v8, %v101_v7  ;;  %v86_v12 = vld [vmem:[%s1733_s9 + $0x58] sm:$0xff]  ;;  %v87_v17 = vld [vmem:[%s1733_s9 + $0x60] sm:$0xff]  ;;  %v105_v20 = vld [vmem:[%s1733_s9 + $0xf0] sm:$0xff] }
  0x1d   :  { %v61_v33 = vld [vmem:[%s1735_s5] sm:$0xf]  ;;  %v146_v62 = vld [vmem:[%s1737_s11 + $0x18] sm:$0xff]  ;;  %v149_v6 = vld [vmem:[%s1737_s11 + $0x30] sm:$0xff] }
  0x1e   :  { %1199 = vmatpush3.bf16.msra.mxu0 %v1198_v15  ;;  %v104_v15 = vld [vmem:[%s1733_s9 + $0xe8] sm:$0xff]  ;;  %v150_v7 = vld [vmem:[%s1737_s11 + $0x38] sm:$0xff] }
  0x1f   :  { %1201 = vmatprep.subr.bf16.mxu0 %v1200_v18  ;;  %v88_v18 = vld [vmem:[%s1733_s9 + $0x68] sm:$0xff] }
  0x20   :  { %v1174_v19 = vpack.c.bf16 %v88_v18, %v87_v17  ;;  %v155_v17 = vld [vmem:[%s1737_s11 + $0x60] sm:$0xff]  ;;  %v156_v18 = vld [vmem:[%s1737_s11 + $0x68] sm:$0xff] }
  0x22   :  { %1203 = vmatpush3.bf16.msra.mxu0 %v1202_v21  ;;  %v106_v21 = vld [vmem:[%s1733_s9 + $0xf8] sm:$0xff] }
  0xd6   :  { %v235_v38 = vpop.f32.mrb[0].mxu0 }
  0xd7   :  { %v236_v42 = vadd.f32 %v948_v25, %v235_v38  ;;  %v1060_v43 = vpop.f32.mrb[1].mxu0  ;;  %v1204_v25 = vpack.c.bf16 %v136_v23, %v135_v22  ;;  %v71_v38 = vld [vmem:[%s1730_s8 + $0x20] sm:$0xff]  ;;  %v1176_v22 = vpack.c.bf16 %v106_v21, %v105_v20  ;;  %v89_v23 = vld [vmem:[%s1733_s9 + $0x70] sm:$0xff] }
  0xd8   :  { %v1142_v41 = vpack.c.bf16 %v71_v38, %v67_v37  ;;  %v75_v43 = vld [vmem:[%s1733_s9] sm:$0xff] }
  0xd9   :  { %856 = vrot.lane.b32.xlu1 %v236_v42, %s1254_s1  ;;  %v239_v47 = vmax.f32 %v236_v42, 0.0  ;;  %1205 = vmatprep.subr.bf16.mxu0 %v1204_v25  ;;  %v90_v25 = vld [vmem:[%s1733_s9 + $0x78] sm:$0xff] }
  0xda   :  { %1207 = vmatpush3.bf16.msra.mxu0 %v1206_v28  ;;  %v1178_v26 = vpack.c.bf16 %v90_v25, %v89_v23  ;;  %v242_v28 = vshrl.u32 %v241_v27, 7 }
  0xdb   :  { %413 = vrot.lane.b32.xlu0 %v239_v47, %s1255_s30  ;;  %950 = vmatmul.mubr.msk.f32.vlgmr.msra.gmra.mrb[0].mxu1 %vm261_vm3, %v239_v47 }
  0xdc   :  { %1129 = vmatpush1.bf16.msra.mxu1 %v1128_v46  ;;  %400 = vmatprep.mubr.f32.mxu1 %v1252_v0  ;;  %v93_v46 = vld [vmem:[%s1733_s9 + $0x90] sm:$0xff]  ;;  %v255_v32 = vsub.s32 3, %v242_v28 }
  0xdd   :  { %1131 = vmatprep.subr.bf16.mxu1 %v1130_v48  ;;  %1209 = vmatprep.subr.bf16.mxu0 %v1208_v31  ;;  %v1150_v48 = vpack.c.bf16 %v76_v44, %v75_v43  ;;  %v251_v31 = vsub.s32 2, %v242_v28  ;;  %v243_v44 = vsub.s32 0, %v242_v28 }
  0xde   :  { %1211 = vmatpush3.bf16.msra.mxu0 %v1210_v35  ;;  %v256_v37 = vrot.slane %v61_v33, %v255_v32 }
  0xdf   :  { %638 = vrot.lane.b32.xlu0 %v236_v42, %s1256_s22  ;;  %v1525_v34 = vpop.f32.mrb[2].mxu0  ;;  %1218 = vmatprep.subr.bf16.mxu0 %v1257_v4  ;;  %v1148_v42 = vpack.c.bf16 %v92_v40, %v91_v39  ;;  %v252_v35 = vrot.slane %v61_v33, %v251_v31 }
  0xe0   :  { %1133 = vmatpush1.bf16.msra.mxu1 %v1132_v57  ;;  %v1527_v36 = vpop.f32.mrb[3].mxu0  ;;  %v80_v57 = vld [vmem:[%s1733_s9 + $0x28] sm:$0xff] }
  0xe1   :  { %1134 = vmatprep.subr.bf16.mxu1 %v1257_v4  ;;  %v1158_v59 = vpack.c.bf16 %v80_v57, %v79_v56  ;;  %v141_v57 = vld [vmem:[%s1736_s10 + $0x10] sm:$0xff] }
  0xe3   :  { %951 = vmatmul.mubr.msk.f32.vlgmr.msra.gmra.mrb[2].mxu1 %vm261_vm3, %v239_v47  ;;  %v94_v47 = vld [vmem:[%s1733_s9 + $0x98] sm:$0xff] }
  0xe4   :  { %1136 = vmatpush3.bf16.msra.mxu1 %v1135_v3  ;;  %1069 = vmatprep.mubr.msk.f32.mxu1 %vm1253_vm1, %v1252_v0  ;;  %v1152_v49 = vpack.c.bf16 %v94_v47, %v93_v46  ;;  %v1164_v3 = vpack.c.bf16 %v100_v1, %v99_v63  ;;  %v244_v46 = vrot.slane %v61_v33, %v243_v44  ;;  %v147_v1 = vld [vmem:[%s1737_s11 + $0x20] sm:$0xff] }
  0xe5   :  { %1137 = vmatprep.subr.bf16.mxu1 %v1257_v4 }
  0xe8   :  { %1139 = vmatpush3.bf16.msra.mxu1 %v1138_v13  ;;  %v1170_v13 = vpack.c.bf16 %v86_v12, %v85_v11  ;;  %v151_v11 = vld [vmem:[%s1737_s11 + $0x40] sm:$0xff]  ;;  %v152_v12 = vld [vmem:[%s1737_s11 + $0x48] sm:$0xff] }
  0xe9   :  { %1141 = vmatprep.subr.bf16.mxu1 %v1140_v14  ;;  %v103_v14 = vld [vmem:[%s1733_s9 + $0xe0] sm:$0xff] }
  0xea   :  { %v1172_v16 = vpack.c.bf16 %v104_v15, %v103_v14  ;;  %v153_v14 = vld [vmem:[%s1737_s11 + $0x50] sm:$0xff]  ;;  %v154_v15 = vld [vmem:[%s1737_s11 + $0x58] sm:$0xff] }
 0x14d   :  { %v414_v45 = vpop.permute.xlu0 %413 }
 0x14e   :  { %1070 = vmatmul.mubr.msk.f32.vlgmr.msra.gmra.mrb[4].mxu1 %vm261_vm3, %v414_v45  ;;  %v247_v45 = vsub.s32 1, %v242_v28  ;;  %v157_v28 = vld [vmem:[%s1737_s11 + $0x70] sm:$0xff] }
 0x14f   :  { %1143 = vmatpush1.bf16.msra.mxu1 %v1142_v41  ;;  %555 = vmatprep.mubr.f32.mxu1 %v1252_v0 }
 0x150   :  { %1149 = vmatprep.subr.bf16.mxu1 %v1148_v42  ;;  %v248_v47 = vrot.slane %v61_v33, %v247_v45 }
 0x151   :  { %v639_v23 = vpop.permute.xlu0 %638 }
 0x152   :  { %954 = vmatmul.mubr.msk.f32.vlgmr.msra.gmra.mrb[6].mxu1 %vm487_vm2, %v1379_v24  ;;  %v98_v24 = vld [vmem:[%s1733_s9 + $0xb8] sm:$0xff] }
 0x153   :  { %1151 = vmatpush3.bf16.msra.mxu1 %v1150_v48  ;;  %v1160_v60 = vpack.c.bf16 %v98_v24, %v97_v58  ;;  %v143_v24 = vld [vmem:[%s1737_s11] sm:$0xff] }
 0x154   :  { %1153 = vmatprep.subr.bf16.mxu1 %v1152_v49 }
 0x157   :  { %1155 = vmatpush3.bf16.msra.mxu1 %v1154_v54 }
 0x158   :  { %1157 = vmatprep.subr.bf16.mxu1 %v1156_v55  ;;  %v140_v55 = vld [vmem:[%s1736_s10 + $0x8] sm:$0xff] }
 0x15b   :  { %1159 = vmatpush3.bf16.msra.mxu1 %v1158_v59  ;;  %v144_v59 = vld [vmem:[%s1737_s11 + $0x8] sm:$0xff] }
 0x15c   :  { %1161 = vmatprep.subr.bf16.mxu1 %v1160_v60  ;;  %v145_v60 = vld [vmem:[%s1737_s11 + $0x10] sm:$0xff]  ;;  %v1219_v61 = vpack.c.bf16 %v144_v59, %v143_v24 }
 0x15d   :  { %v1222_v63 = vpack.c.bf16 %v146_v62, %v145_v60 }
 0x15f   :  { %1163 = vmatpush3.bf16.msra.mxu1 %v1162_v2  ;;  %v148_v2 = vld [vmem:[%s1737_s11 + $0x28] sm:$0xff] }
 0x160   :  { %1165 = vmatprep.subr.bf16.mxu1 %v1164_v3  ;;  %v1225_v3 = vpack.c.bf16 %v148_v2, %v147_v1 }
 0x163   :  { %1167 = vmatpush3.bf16.msra.mxu1 %v1166_v9 }
 0x164   :  { %1169 = vmatprep.subr.bf16.mxu1 %v1168_v10  ;;  %v1228_v10 = vpack.c.bf16 %v150_v7, %v149_v6 }
 0x167   :  { %1171 = vmatpush3.bf16.msra.mxu1 %v1170_v13  ;;  %v1231_v13 = vpack.c.bf16 %v152_v12, %v151_v11 }
 0x168   :  { %1173 = vmatprep.subr.bf16.mxu1 %v1172_v16  ;;  %v1234_v16 = vpack.c.bf16 %v154_v15, %v153_v14 }
 0x16b   :  { %1175 = vmatpush3.bf16.msra.mxu1 %v1174_v19  ;;  %v1237_v19 = vpack.c.bf16 %v156_v18, %v155_v17 }
 0x16c   :  { %1177 = vmatprep.subr.bf16.mxu1 %v1176_v22 }
 0x16f   :  { %1179 = vmatpush3.bf16.msra.mxu1 %v1178_v26 }
 0x170   :  { %1212 = vmatprep.subr.bf16.mxu1 %v1257_v4 }
 0x1ae   :  { %v331_v29 = vpop.f32.mrb[0].mxu1 }
 0x1af   :  { %v333_v30 = vpop.f32.mrb[1].mxu1  ;;  %v332_v50 = vadd.f32 %v331_v29, %v244_v46  ;;  %v158_v29 = vld [vmem:[%s1737_s11 + $0x78] sm:$0xff] }
 0x1b0   :  { %v334_v51 = vadd.f32 %v333_v30, %v248_v47  ;;  %v1240_v30 = vpack.c.bf16 %v158_v29, %v157_v28 }
 0x1b6   :  { %v402_v38 = vpop.f32.mrb[2].mxu1 }
 0x1b7   :  { %v403_v39 = vadd.f32 %v402_v38, %v252_v35  ;;  %v404_v40 = vpop.f32.mrb[3].mxu1 }
 0x1b8   :  { %v405_v41 = vadd.f32 %v404_v40, %v256_v37  ;;  %v857_v37 = vpop.permute.xlu1 %856 }
 0x1b9   :  { %v635_v42 = vmul.f32 %v1525_v34, %v403_v39 }
 0x1ba   :  { %v636_v43 = vmul.f32 %v1527_v36, %v405_v41  ;;  %v139_v36 = vld [vmem:[%s1736_s10] sm:$0xff] }
 0x1bb   :  { %v1213_v56 = vpack.c.bf16 %v140_v55, %v139_v36 }
 0x1bc   :  { %775 = vmatprep.mubr.f32.mxu0 %v636_v43 }
 0x1bd   :  { %776 = vmatmul.mubr.f32.vlgmr.msra.gmra.mrb[4].mxu0 %v635_v42 }
 0x1be   :  { %1115 = vmatprep.mubr.msk.f32.mxu0 %vm1253_vm1, %v1252_v0  ;;  %1220 = vmatpush3.bf16.msra.mxu0 %v1219_v61 }
 0x1bf   :  { %1221 = vmatprep.subr.bf16.mxu0 %v1257_v4 }
 0x1c2   :  { %1223 = vmatpush3.bf16.msra.mxu0 %v1222_v63 }
 0x1c3   :  { %1224 = vmatprep.subr.bf16.mxu0 %v1257_v4 }
 0x1c6   :  { %1226 = vmatpush3.bf16.msra.mxu0 %v1225_v3 }
 0x1c7   :  { %1227 = vmatprep.subr.bf16.mxu0 %v1257_v4 }
 0x1ca   :  { %1229 = vmatpush3.bf16.msra.mxu0 %v1228_v10 }
 0x1cb   :  { %1230 = vmatprep.subr.bf16.mxu0 %v1257_v4 }
 0x1ce   :  { %1232 = vmatpush3.bf16.msra.mxu0 %v1231_v13 }
 0x1cf   :  { %1233 = vmatprep.subr.bf16.mxu0 %v1257_v4 }
 0x1d2   :  { %1235 = vmatpush3.bf16.msra.mxu0 %v1234_v16 }
 0x1d3   :  { %1236 = vmatprep.subr.bf16.mxu0 %v1257_v4 }
 0x1d6   :  { %1238 = vmatpush3.bf16.msra.mxu0 %v1237_v19 }
 0x1d7   :  { %1239 = vmatprep.subr.bf16.mxu0 %v1257_v4 }
 0x1da   :  { %1241 = vmatpush3.bf16.msra.mxu0 %v1240_v30 }
 0x221   :  { %v1644_v48 = vpop.f32.mrb[4].mxu1 }
 0x222   :  { %v1071_v49 = vpop.f32.mrb[5].mxu1 }
 0x225   :  { %v557_v52 = vpop.f32.mrb[6].mxu1 }
 0x226   :  { %v633_v53 = vmul.f32 %v557_v52, %v332_v50  ;;  %v559_v54 = vpop.f32.mrb[7].mxu1 }
 0x227   :  { %v634_v34 = vmul.f32 %v559_v54, %v334_v51 }
 0x229   :  { %705 = vmatprep.mubr.f32.mxu1 %v634_v34 }
 0x22a   :  { %706 = vmatmul.mubr.f32.vlgmr.msra.gmra.mrb[8].mxu1 %v633_v53 }
 0x22b   :  { %1080 = vmatprep.mubr.msk.f32.mxu1 %vm1253_vm1, %v1252_v0  ;;  %1214 = vmatpush3.bf16.msra.mxu1 %v1213_v56  ;;  %v142_v0 = vld [vmem:[%s1736_s10 + $0x18] sm:$0xff] }
 0x22c   :  { %1215 = vmatprep.subr.bf16.mxu1 %v1257_v4  ;;  %v1216_v58 = vpack.c.bf16 %v142_v0, %v141_v57  ;;  %v952_v4 = vld [vmem:[%s1738_s7] ss:$0 sm:$0xff] }
 0x22d   :  { %v484_v31 = vadd.f32 %v952_v4, %v1644_v48 }
 0x22f   :  { %1217 = vmatpush3.bf16.msra.mxu1 %v1216_v58 }
 0x290   :  { %v1031_v5 = vpop.f32.mrb[4].mxu0 }
 0x291   :  { %v1032_v8 = vpop.f32.mrb[5].mxu0 }
 0x292   :  { %v1033_v9 = vadd.f32 %v1032_v8, %v1031_v5 }
 0x2fd   :  { %v996_v20 = vpop.f32.mrb[8].mxu1 }
 0x2fe   :  { %v997_v21 = vpop.f32.mrb[9].mxu1 }
 0x2ff   :  { %v998_v22 = vadd.f32 %v997_v21, %v996_v20 }
 0x301   :  { %v708_v25 = vadd.f32 %v998_v22, %v639_v23 }
 0x303   :  { %v778_v26 = vadd.f32 %v1033_v9, %v708_v25 }
 0x305   :  { %v781_v27 = vmax.f32 %v778_v26, 0.0 }
 0x307   :  { %1081 = vmatmul.mubr.msk.f32.vlgmr.msra.gmra.mrb[10].mxu1 %vm261_vm3, %v781_v27 }
 0x3da   :  { %v851_v32 = vpop.f32.mrb[10].mxu1 }
 0x3db   :  { %v855_v33 = vmul.f32 %v851_v32, %v484_v31  ;;  %v1082_v35 = vpop.f32.mrb[11].mxu1 }
 0x3dd   :  { %1116 = vmatmul.mubr.f32.vlgmr.msra.gmra.mrb[6].mxu0 %v855_v33 }
 0x4b0   :  { %v925_v38 = vpop.f32.mrb[6].mxu0 }
 0x4b1   :  { %v926_v39 = vadd.f32 %v925_v38, %v857_v37  ;;  %v1117_v40 = vpop.f32.mrb[7].mxu0 }
 0x4b3   :  { %v930_v41 = vsel %vm929_vm4, %v926_v39, -inf }
 0x4b4   :  { %931 = vmax.xlane.f32.xlu1 %v930_v41 }
 0x541   :  { %v932_v42 = vpop.xlane.xlu1 %931 }
 0x542   :  { %v933_v43 = vsub.f32 %v926_v39, %v932_v42 }
 0x544   :  { %v934_v44 = vmul.f32 1.442695, %v933_v43 }
 0x546   :  { %1248 = vpow2.f32 %v934_v44 }
 0x550   :  { %v1249_v45 = vpop.eup %1248 }
 0x551   :  { %v936_v46 = vsel %vm929_vm4, %v1249_v45, 0.0 }
 0x552   :  { %937 = vadd.xlane.f32.xlu0 %v936_v46 }
 0x5df   :  { %v938_v47 = vpop.xlane.xlu0 %937 }
 0x5e0   :  { %1250 = vlog2.f32 %v938_v47 }
 0x5ea   :  { %v1251_v48 = vpop.eup %1250 }
 0x5eb   :  { %v940_v49 = vmul.f32 0.6931472, %v1251_v48 }
 0x5ed   :  { %v941_v50 = vadd.f32 %v940_v49, %v932_v42 }
 0x5ef   :  { %v942_v51 = vsub.f32 %v926_v39, %v941_v50 }
 0x5f1   :  { %943 = vst.msk [vmem:[%s1739_s12] sm:$0x3] %vm929_vm4, %v942_v51 }

</bundles_post_ra>
